<compile_context>
chip_gen: v7x
topology: tpu7x:2x2x1
jax: 0.10.0
libtpu: 0.0.40
codegen_flags: <defaults>
</compile_context>

<pallas_src>
import jax
import jax.numpy as jnp
from jax.experimental import pallas as pl
from jax.experimental.pallas import tpu as pltpu


# ---------------------------------------------------------------------------
# Pallas kernel: row-tiled dense matmul  (M, K) @ (K, N) -> (M, N)
# K and N are small, so the full weight stays VMEM-resident across all grid
# steps; we only tile over rows.
# ---------------------------------------------------------------------------
def _combine_kernel(x_ref, w_ref, o_ref):
    o_ref[...] = jnp.dot(
        x_ref[...], w_ref[...], preferred_element_type=jnp.float32
    ).astype(o_ref.dtype)


def _round_up(x, m):
    return ((x + m - 1) // m) * m


def _combine_2d(x2d, w, *, tm_max=8192):
    """x2d: (M, K) @ w: (K, N) -> (M, N) with a row-tiled Pallas matmul."""
    M, K = x2d.shape
    K2, N = w.shape
    assert K == K2, (K, K2)

    if M <= tm_max:
        # Single full-extent row block (legal for any M; no padding in HBM).
        tm = M
        grid_m = 1
    else:
        # At least two row blocks (lets the 'parallel' axis split across the
        # two TensorCores on v7x), each a multiple of 8 sublanes.
        tm = min(tm_max, _round_up(pl.cdiv(M, 2), 8))
        grid_m = pl.cdiv(M, tm)

    cost = pl.CostEstimate(
        flops=2 * M * K * N,
        transcendentals=0,
        bytes_accessed=4 * (M * K + K * N + M * N),
    )

    return pl.pallas_call(
        _combine_kernel,
        out_shape=jax.ShapeDtypeStruct((M, N), x2d.dtype),
        grid_spec=pltpu.PrefetchScalarGridSpec(
            num_scalar_prefetch=0,
            grid=(grid_m,),
            in_specs=[
                pl.BlockSpec((tm, K), lambda i: (i, 0)),  # row tile, full K
                pl.BlockSpec((K, N), lambda i: (0, 0)),   # weight, VMEM-resident
            ],
            out_specs=pl.BlockSpec((tm, N), lambda i: (i, 0)),
        ),
        compiler_params=pltpu.CompilerParams(
            dimension_semantics=("parallel",),       # shard rows across TCs
            vmem_limit_bytes=32 * 1024 * 1024,       # fits v5e/v6e/v7x budgets
        ),
        cost_estimate=cost,
    )(x2d, w)


def _pack_factor(M, N, *, max_width=512):
    """Rows fused per packed row so the output last dim becomes lane-dense.

    A row-major (M, K) -> (M/g, g*K) reshape is byte-identical (free), and the
    matching weight is block-diagonal, so packing costs no extra HBM traffic.
    """
    best = 1
    for g in (2, 4, 8):
        if M % g != 0 or g * N > max_width:
            continue
        best = g
        if (g * N) % 128 == 0:      # full 128-lane output rows: stop here
            break
    return best


def _block_diag_weight(w, g):
    if g == 1:
        return w
    K, N = w.shape
    wg = jnp.zeros((g * K, g * N), dtype=w.dtype)
    for i in range(g):
        wg = wg.at[i * K:(i + 1) * K, i * N:(i + 1) * N].set(w)
    return wg


def combine_array(x, w, *, tm_max=8192):
    """x: (..., K) -> (..., N) computed as x @ w with the Pallas kernel."""
    K, N = w.shape
    assert x.shape[-1] == K, (x.shape, K)
    lead = x.shape[:-1]
    M = 1
    for d in lead:
        M *= d
    if M == 0:
        return jnp.zeros(lead + (N,), dtype=x.dtype)

    g = _pack_factor(M, N)
    x2d = x.reshape(M // g, g * K)            # free row-major reshape
    wg = _block_diag_weight(w, g)
    out2d = _combine_2d(x2d, wg, tm_max=tm_max)   # (M/g, g*N)
    return out2d.reshape(lead + (N,))         # free reshape back


# ---------------------------------------------------------------------------
# JAX equivalent of CombineRadialSpecies.
# A "spherical expansion" here is a dict keyed by spherical_harmonics_l, each
# entry holding:
#   "values":    (n_samples, 2l+1, n_species * max_radial)            float32
#   "gradients": optional (n_grad_samples, 3, 2l+1, n_species * max_radial)
# ---------------------------------------------------------------------------
class CombineRadialSpecies:
    def __init__(
        self,
        n_species,
        max_radial,
        n_combined_basis,
        key=None,
        *,
        explicit_combining_matrix=None,
        tm_max=8192,
    ):
        self.n_species = n_species
        self.max_radial = max_radial
        self.n_combined_basis = n_combined_basis
        self.tm_max = tm_max
        if explicit_combining_matrix is None:
            # torch.rand -> uniform [0, 1), deterministic via PRNGKey
            self.combining_matrix = jax.random.uniform(
                key,
                (max_radial * n_species, n_combined_basis),
                dtype=jnp.float32,
            )
        else:
            self.combining_matrix = explicit_combining_matrix

    def detach(self):
        return CombineRadialSpecies(
            self.n_species,
            self.max_radial,
            self.combining_matrix.shape[1],
            explicit_combining_matrix=self.combining_matrix,
            tm_max=self.tm_max,
        )

    def forward(self, spherical_expansion):
        w = self.combining_matrix
        out = {}
        for l, block in spherical_expansion.items():
            new_block = {
                "values": combine_array(block["values"], w, tm_max=self.tm_max)
            }
            grads = block.get("gradients")
            if grads is not None:
                new_block["gradients"] = combine_array(grads, w, tm_max=self.tm_max)
            out[l] = new_block
        return out

    # pure-JAX reference (no Pallas) for correctness checking
    def forward_ref(self, spherical_expansion):
        w = self.combining_matrix
        out = {}
        for l, block in spherical_expansion.items():
            new_block = {"values": block["values"] @ w}
            grads = block.get("gradients")
            if grads is not None:
                new_block["gradients"] = grads @ w
            out[l] = new_block
        return out

    # TODO(synk): metatensor Labels / samples / components / properties
    # metadata plumbing has no Pallas equivalent; only the dense
    # `@ combining_matrix` compute is implemented here.


if __name__ == "__main__":
    key = jax.random.PRNGKey(0)
    k_w, k_data = jax.random.split(key)

    n_species = 4
    max_radial = 6
    n_combined_basis = 32
    n_properties = n_species * max_radial  # 24

    module = CombineRadialSpecies(n_species, max_radial, n_combined_basis, k_w)

    # Small synthetic spherical expansion with l = 0, 1, 2,
    # 8 samples per block and 5 gradient samples (positions gradient, xyz).
    # Exercises both the packed (lane-dense, values) and plain (gradients,
    # odd row counts) kernel paths.
    spherical_expansion = {}
    n_samples = 8
    n_grad_samples = 5
    keys = jax.random.split(k_data, 6)
    for i, l in enumerate((0, 1, 2)):
        n_comp = 2 * l + 1
        vals = jax.random.normal(
            keys[2 * i], (n_samples, n_comp, n_properties), dtype=jnp.float32
        )
        grads = jax.random.normal(
            keys[2 * i + 1],
            (n_grad_samples, 3, n_comp, n_properties),
            dtype=jnp.float32,
        )
        spherical_expansion[l] = {"values": vals, "gradients": grads}

    out = module.forward(spherical_expansion)
    ref = module.forward_ref(spherical_expansion)

    # Block on results and check against the pure-JAX reference.
    for l in out:
        v = jax.block_until_ready(out[l]["values"])
        g = jax.block_until_ready(out[l]["gradients"])
        assert v.shape == (n_samples, 2 * l + 1, n_combined_basis)
        assert g.shape == (n_grad_samples, 3, 2 * l + 1, n_combined_basis)
        assert jnp.allclose(v, ref[l]["values"], atol=1e-5, rtol=1e-5)
        assert jnp.allclose(g, ref[l]["gradients"], atol=1e-5, rtol=1e-5)

    print("KERNEL_OK")
</pallas_src>

<mosaic_0001>
module attributes {stable_mosaic.version = 11 : i64} {
  func.func @_combine_kernel(%arg0: i32, %arg1: memref<2x96xf32, #tpu.memory_space<vmem>>, %arg2: memref<96x128xf32, #tpu.memory_space<vmem>>, %arg3: memref<2x128xf32, #tpu.memory_space<vmem>>) attributes {dimension_semantics = [#tpu.dimension_semantics<parallel>], iteration_bounds = array<i64: 1>, scalar_prefetch = 0 : i64, scratch_operands = 0 : i64, tpu.core_type = #tpu.core_type<tc>, window_params = [{transform_indices = @transform_0, window_bounds = array<i64: 2, 96>}, {pipeline_mode = #tpu.pipeline_mode<synchronous>, transform_indices = @transform_1, window_bounds = array<i64: 96, 128>}, {transform_indices = @transform_2, window_bounds = array<i64: 2, 128>}]} {
    %c0 = arith.constant 0 : index
    %c0_0 = arith.constant 0 : index
    %0 = vector.load %arg1[%c0, %c0_0] : memref<2x96xf32, #tpu.memory_space<vmem>>, vector<2x96xf32>
    %c0_1 = arith.constant 0 : index
    %c0_2 = arith.constant 0 : index
    %1 = vector.load %arg2[%c0_1, %c0_2] : memref<96x128xf32, #tpu.memory_space<vmem>>, vector<96x128xf32>
    %cst = arith.constant dense<0.000000e+00> : vector<2x128xf32>
    %2 = tpu.matmul %0, %1, %cst {dimension_numbers = #tpu.dot_dimension_numbers<[1], [0], [0], [1], [0, 0, 1, 1], [], []>} : vector<2x96xf32>, vector<96x128xf32>, vector<2x128xf32> -> vector<2x128xf32>
    %c0_3 = arith.constant 0 : index
    %c0_4 = arith.constant 0 : index
    %3 = vector.load %arg3[%c0_3, %c0_4] : memref<2x128xf32, #tpu.memory_space<vmem>>, vector<2x128xf32>
    tpu.vector_store %arg3[%c0_3, %c0_4], %2 {strides = array<i32>} : memref<2x128xf32, #tpu.memory_space<vmem>>, vector<2x128xf32>,
    return
  }
  func.func @transform_0(%arg0: i32) -> (i32, i32) {
    %c0_i32 = arith.constant 0 : i32
    %c0_i32_0 = arith.constant 0 : i32
    return %arg0, %c0_i32 : i32, i32
  }
  func.func @transform_1(%arg0: i32) -> (i32, i32) {
    %c0_i32 = arith.constant 0 : i32
    %c0_i32_0 = arith.constant 0 : i32
    %c0_i32_1 = arith.constant 0 : i32
    return %c0_i32, %c0_i32_0 : i32, i32
  }
  func.func @transform_2(%arg0: i32) -> (i32, i32) {
    %c0_i32 = arith.constant 0 : i32
    %c0_i32_0 = arith.constant 0 : i32
    return %arg0, %c0_i32 : i32, i32
  }
}

</mosaic_0001>

<bundles_post_ra>
// kernel: tpu_custom_call.1
= control target key start
LH: loop header
LB: loop body
LE: loop exit
PB: predicated region body
PF: predicated region fallthrough
CT: control target
= control target key end

     0   :  { %7 = vsyncpa [#allocation3], 0  ;;  %s347_s0 = inlined_call_operand.hbm [shape: f32[2,96], index: 0, kind: input, shape index: {}]   ;;  %s348_s1 = inlined_call_operand.hbm [shape: f32[96,128], index: 1, kind: input, shape index: {}]   ;;  %s349_s2 = inlined_call_operand.hbm [shape: f32[2,128], index: 2, kind: output, shape index: {}]  }
   0x1   :  { %8 = vsyncpa [#allocation6], 0 }
   0x2   :  { %9 = vsyncpa [#allocation4], 0  ;;  %s281_s9 = smov [#allocation2]   ;;  %s282_s11 = smov [#allocation5]  }
   0x3   :  { %s16_s10 = sshll.u32 %s281_s9, 4  ;;  %s25_s12 = sshll.u32 %s282_s11, 4  ;;  %s17_s10 = int_to_ptr.vmem [resolvable:$true] %s16_s10  ;;  %s304_s12 = int_to_ptr.vmem [resolvable:$true] %s25_s12 }
   0x4   :  { %s209_s15 = scalar_lea.hbm %s347_s0, 32 }
   0x5   :  { %p210_p0 = scmp.ne.s32.totalorder %s347_s0, %s209_s15  ;;  %p213_p1 = scmp.lt.u32.totalorder %s209_s15, %s347_s0 }
   0x7   :  { %p215_p2 = pnand %p213_p1, %p210_p0 }
   0x9   :  { %218 = shalt.err (!%p215_p2)
}
   0xa   :  { %s219_s20 = scalar_lea.vmem %s17_s10, 32  ;;  %p224_p4 = scmp.lt.s32.totalorder %s17_s10, %s17_s10 }
   0xb   :  { %p220_p3 = scmp.ne.s32.totalorder %s17_s10, %s219_s20  ;;  %p225_p5 = scmp.lt.s32.totalorder %s219_s20, %s219_s20 }
   0xd   :  { %p226_p6 = por %p225_p5, %p224_p4 }
   0xf   :  { %p227_p7 = pnand %p226_p6, %p220_p3 }
  0x11   :  { %230 = shalt.err (!%p227_p7)
}
  0x12   :  { %19 = dma.hbm_to_vmem [thread:$0]  %s347_s0, 32, %s17_s10, [#allocation3]  }
  0x13   :  { %s231_s25 = scalar_lea.hbm %s348_s1, 1536 }
  0x14   :  { %p232_p8 = scmp.ne.s32.totalorder %s348_s1, %s231_s25  ;;  %p235_p9 = scmp.lt.u32.totalorder %s231_s25, %s348_s1 }
  0x16   :  { %p237_p10 = pnand %p235_p9, %p232_p8 }
  0x18   :  { %240 = shalt.err (!%p237_p10)
}
  0x19   :  { %s241_s30 = scalar_lea.vmem %s304_s12, 1536  ;;  %p246_p12 = scmp.lt.s32.totalorder %s304_s12, %s304_s12 }
  0x1a   :  { %p242_p11 = scmp.ne.s32.totalorder %s304_s12, %s241_s30  ;;  %p247_p13 = scmp.lt.s32.totalorder %s241_s30, %s241_s30 }
  0x1c   :  { %p248_p0 = por %p247_p13, %p246_p12 }
  0x1e   :  { %p249_p1 = pnand %p248_p0, %p242_p11 }
  0x20   :  { %252 = shalt.err (!%p249_p1)
}
  0x21   :  { %s283_s0 = smov 128   ;;  %s284_s3 = smov 8  }
  0x22   :  { %31 = dma.hbm_to_vmem [thread:$0]  %s348_s1, 1536, %s304_s12, [#allocation6], %s283_s0, %s283_s0, %s284_s3  }
  0x23   :  { %275 = dma.done.wait [#allocation3], 32  }
  0x24   :  { %276 = vsyncadd [#allocation3], 4294967264 }
  0x25   :  { %277 = dma.done.wait [#allocation6], 1536  }
  0x26   :  { %278 = vsyncadd [#allocation6], 4294965760  ;;  %v285_v0 = vmov 0.0|0.0   ;;  %vm286_vm0 = vmmov 0   ;;  %v287_v1 = vmov 0.0   ;;  %v39_v2 = vld [vmem:[#allocation5] sm:$0xff] }
  0x27   :  { %183 = vmatprep.subr.bf16.mxu0 %v285_v0  ;;  %180 = vmatprep.mubr.msk.f32.mxu0 %vm286_vm0, %v287_v1  ;;  %v40_v3 = vld [vmem:[#allocation5 + $0x8] sm:$0xff]  ;;  %v41_v4 = vld [vmem:[#allocation5 + $0x10] sm:$0xff]  ;;  %v42_v6 = vld [vmem:[#allocation5 + $0x18] sm:$0xff]  ;;  %vm51_vm1 = vcmask 785408   ;;  %s288_s1 = smov [#allocation7]  }
  0x28   :  { %v184_v5 = vpack.c.bf16 %v40_v3, %v39_v2  ;;  %v187_v7 = vpack.c.bf16 %v42_v6, %v41_v4  ;;  %v43_v8 = vld [vmem:[#allocation5 + $0x20] sm:$0xff]  ;;  %v44_v9 = vld [vmem:[#allocation5 + $0x28] sm:$0xff]  ;;  %v45_v11 = vld [vmem:[#allocation5 + $0x30] sm:$0xff]  ;;  %s132_s6 = sshll.u32 %s288_s1, 4  ;;  %s133_s6 = int_to_ptr.vmem [resolvable:$true] %s132_s6 }
  0x29   :  { %v190_v10 = vpack.c.bf16 %v44_v9, %v43_v8  ;;  %v46_v12 = vld [vmem:[#allocation5 + $0x38] sm:$0xff]  ;;  %v47_v14 = vld [vmem:[#allocation5 + $0x40] sm:$0xff]  ;;  %v48_v15 = vld [vmem:[#allocation5 + $0x48] sm:$0xff]  ;;  %s253_s7 = scalar_lea.vmem %s133_s6, 32  ;;  %p258_p3 = scmp.lt.s32.totalorder %s133_s6, %s133_s6 }
  0x2a   :  { %185 = vmatpush3.bf16.msra.mxu0 %v184_v5  ;;  %v193_v13 = vpack.c.bf16 %v46_v12, %v45_v11  ;;  %v196_v16 = vpack.c.bf16 %v48_v15, %v47_v14  ;;  %v49_v17 = vld [vmem:[#allocation5 + $0x50] sm:$0xff]  ;;  %v50_v18 = vld [vmem:[#allocation5 + $0x58] sm:$0xff]  ;;  %p254_p2 = scmp.ne.s32.totalorder %s133_s6, %s253_s7  ;;  %p259_p4 = scmp.lt.s32.totalorder %s253_s7, %s253_s7 }
  0x2b   :  { %186 = vmatprep.subr.bf16.mxu0 %v285_v0  ;;  %v199_v19 = vpack.c.bf16 %v50_v18, %v49_v17  ;;  %v38_v20 = vld [vmem:[#allocation2] sm:$0x3] }
  0x2c   :  { %p260_p5 = por %p259_p4, %p258_p3 }
  0x2e   :  { %188 = vmatpush3.bf16.msra.mxu0 %v187_v7  ;;  %p261_p6 = pnand %p260_p5, %p254_p2 }
  0x2f   :  { %189 = vmatprep.subr.bf16.mxu0 %v285_v0 }
  0x32   :  { %191 = vmatpush3.bf16.msra.mxu0 %v190_v10 }
  0x33   :  { %192 = vmatprep.subr.bf16.mxu0 %v285_v0 }
  0x36   :  { %194 = vmatpush3.bf16.msra.mxu0 %v193_v13 }
  0x37   :  { %195 = vmatprep.subr.bf16.mxu0 %v285_v0 }
  0x3a   :  { %197 = vmatpush3.bf16.msra.mxu0 %v196_v16 }
  0x3b   :  { %198 = vmatprep.subr.bf16.mxu0 %v285_v0 }
  0x3e   :  { %200 = vmatpush3.bf16.msra.mxu0 %v199_v19 }
  0x41   :  { %181 = vmatmul.mubr.msk.f32.vlgmr.msra.gmra.mrb[0].mxu0 %vm51_vm1, %v38_v20 }
 0x114   :  { %v121_v21 = vpop.f32.mrb[0].mxu0 }
 0x115   :  { %125 = vst [vmem:[#allocation7] sm:$0x3] %v121_v21  ;;  %v182_v22 = vpop.f32.mrb[1].mxu0 }
 0x116   :  { %264 = shalt.err (!%p261_p6)
}
 0x117   :  { %s265_s10 = scalar_lea.hbm %s349_s2, 32 }
 0x118   :  { %p266_p7 = scmp.ne.s32.totalorder %s349_s2, %s265_s10  ;;  %p269_p8 = scmp.lt.u32.totalorder %s265_s10, %s349_s2 }
 0x11a   :  { %p271_p9 = pnand %p269_p8, %p266_p7 }
 0x11c   :  { %274 = shalt.err (!%p271_p9)
}
 0x11d   :  { %135 = dma.vmem_to_hbm [thread:$0]  %s133_s6, 32, %s349_s2, [#allocation4]  }
 0x11e   :  { %279 = dma.done.wait [#allocation4], 32  }
 0x11f   :  { %280 = vsyncadd [#allocation4], 4294967264 }
 0x120   :  { %139 = vsyncpa [#allocation3], 1 }
 0x121   :  { %140 = vsyncpa [#allocation6], 1 }
 0x122   :  { %141 = vsyncpa [#allocation4], 1 }

</bundles_post_ra>
